<compile_context>
chip_gen: v6e
topology: v6e:2x2x1
jax: 0.10.0
libtpu: 0.0.40
codegen_flags: <defaults>
</compile_context>

<pallas_src>
import functools

import numpy as np
import jax
import jax.numpy as jnp
from jax import lax
from jax.experimental import pallas as pl
from jax.experimental.pallas import tpu as pltpu


# ---------------------------------------------------------------------------
# Pallas kernel: one batch element per grid step, everything in (C, HWp) layout.
# ---------------------------------------------------------------------------
def conv_block_kernel(x_ref, s1_ref, b1_ref, w1_ref, b1f_ref, w2_ref, b2_ref,
                      mask_ref, out_ref, *, W):
    Cg, C1 = w2_ref.shape[1], w2_ref.shape[2]
    Cin = x_ref.shape[1]
    HWp = x_ref.shape[2]

    x = x_ref[0]                                            # (Cin, HWp) f32

    # BN1 (folded affine, per-channel = per-sublane-row) + ReLU, f32 VPU math.
    h1 = jnp.maximum(x * s1_ref[...] + b1_ref[...], 0.0)    # (Cin, HWp)

    # 1x1 conv as one MXU matmul (bf16 operands, f32 accumulation).  BN2 scale,
    # conv1 bias and BN2 bias are folded into w1 / b1f in the wrapper.  ReLU.
    y1 = jnp.dot(w1_ref[...], h1.astype(jnp.bfloat16),
                 preferred_element_type=jnp.float32)
    h2 = jnp.maximum(y1 + b1f_ref[...], 0.0)                # (C1, HWp) f32

    # 3x3 conv, padding=1: accumulate one small MXU matmul per spatial tap.
    # Tap = lane-roll of h2 (XLU) * precomputed boundary mask (VPU mul),
    # cast to bf16 just before the dot, then discarded.
    acc = jnp.zeros((Cg, HWp), jnp.float32)
    for t in range(9):
        ki, kj = t // 3, t % 3
        off = (ki - 1) * W + (kj - 1)                       # static flat offset
        tap = h2 if off == 0 else pltpu.roll(h2, shift=(-off) % HWp, axis=1)
        if off != 0:                                        # center tap needs no mask
            tap = tap * mask_ref[t]                         # (1, HWp) 0/1 f32
        acc = acc + jnp.dot(w2_ref[t], tap.astype(jnp.bfloat16),
                            preferred_element_type=jnp.float32)
    conv2 = acc + b2_ref[...]                               # (Cg, HWp) f32

    # torch.cat((conv2_out, x), dim=1): two direct lane-dense stores,
    # no (Cout, HWp) temporary.
    out_ref[0, :Cg, :] = conv2
    out_ref[0, Cg:Cg + Cin, :] = x


# ---------------------------------------------------------------------------
# Host-side helpers
# ---------------------------------------------------------------------------
def _make_tap_masks(H, W, HWp):
    """0/1 f32 masks over the padded lane axis for the 9 conv taps."""
    lane = np.arange(HWp)
    r = lane // W
    c = lane % W
    valid = lane < H * W
    masks = np.zeros((9, 1, HWp), np.float32)
    for ki in range(3):
        for kj in range(3):
            di, dj = ki - 1, kj - 1
            ok = (r + di >= 0) & (r + di < H) & (c + dj >= 0) & (c + dj < W) & valid
            masks[ki * 3 + kj, 0, :] = ok.astype(np.float32)
    return jnp.asarray(masks)


# ---------------------------------------------------------------------------
# Wrapper: NCHW in, NCHW out; only reshape / pad / crop around the pallas_call.
# ---------------------------------------------------------------------------
def conv_block_pallas(x_nchw, p):
    N, Cin, H, W = x_nchw.shape
    HW = H * W
    HWp = ((HW + 127) // 128) * 128                 # lane-dense padded spatial
    C1 = p["w1f"].shape[0]
    Cg = p["w2f"].shape[1]
    Cout = Cg + Cin

    x_flat = x_nchw.reshape(N, Cin, HW)             # contiguous, no transpose
    if HWp != HW:
        x_flat = jnp.pad(x_flat, ((0, 0), (0, 0), (0, HWp - HW)))

    masks = _make_tap_masks(H, W, HWp)              # (9, 1, HWp) f32

    def full(shape):
        return pl.BlockSpec(shape, lambda n, _nd=len(shape): (0,) * _nd)

    flops = 2 * N * HWp * (C1 * Cin + 9 * C1 * Cg)
    bytes_accessed = (4 * N * HWp * (Cin + Cout)            # x + out, f32
                      + 2 * C1 * (Cin + 9 * Cg)             # bf16 weights
                      + 4 * (2 * Cin + C1 + Cg)             # f32 biases/scales
                      + 4 * 9 * HWp)                        # masks

    out = pl.pallas_call(
        functools.partial(conv_block_kernel, W=W),
        out_shape=jax.ShapeDtypeStruct((N, Cout, HWp), jnp.float32),
        grid_spec=pltpu.PrefetchScalarGridSpec(
            num_scalar_prefetch=0,
            grid=(N,),
            in_specs=[
                pl.BlockSpec((1, Cin, HWp), lambda n: (n, 0, 0)),  # x
                full((Cin, 1)),                                    # BN1 scale
                full((Cin, 1)),                                    # BN1 bias
                full((C1, Cin)),                                   # w1 (bf16, BN2-folded)
                full((C1, 1)),                                     # folded bias 1
                full((9, Cg, C1)),                                 # w2 per tap (bf16)
                full((Cg, 1)),                                     # conv2 bias
                full((9, 1, HWp)),                                 # boundary masks
            ],
            out_specs=pl.BlockSpec((1, Cout, HWp), lambda n: (n, 0, 0)),
        ),
        compiler_params=pltpu.CompilerParams(
            dimension_semantics=("parallel",)),
        cost_estimate=pl.CostEstimate(flops=int(flops), transcendentals=0,
                                      bytes_accessed=int(bytes_accessed)),
    )(x_flat, p["s1"], p["b1"], p["w1f"], p["b1f"], p["w2f"], p["b2c"], masks)

    return out[:, :, :HW].reshape(N, Cout, H, W)


# ---------------------------------------------------------------------------
# Parameter construction (deterministic) + pure-JAX reference for verification
# ---------------------------------------------------------------------------
def make_params(key, in_channels, growth_rate):
    C1 = growth_rate * 4
    Cg = growth_rate
    eps = 1e-5
    ks = jax.random.split(key, 12)

    gamma1 = jax.random.normal(ks[0], (in_channels,), jnp.float32) * 0.1 + 1.0
    beta1 = jax.random.normal(ks[1], (in_channels,), jnp.float32) * 0.1
    mean1 = jax.random.normal(ks[2], (in_channels,), jnp.float32) * 0.1
    var1 = jax.random.uniform(ks[3], (in_channels,), jnp.float32, 0.5, 1.5)

    gamma2 = jax.random.normal(ks[4], (C1,), jnp.float32) * 0.1 + 1.0
    beta2 = jax.random.normal(ks[5], (C1,), jnp.float32) * 0.1
    mean2 = jax.random.normal(ks[6], (C1,), jnp.float32) * 0.1
    var2 = jax.random.uniform(ks[7], (C1,), jnp.float32, 0.5, 1.5)

    # torch conv1 weight (O,I,1,1) as a matrix; torch conv2 weight OIHW.
    w1 = jax.random.normal(ks[8], (C1, in_channels), jnp.float32) * 0.2
    cb1 = jax.random.normal(ks[9], (C1,), jnp.float32) * 0.1
    w2 = jax.random.normal(ks[10], (Cg, C1, 3, 3), jnp.float32) * 0.1
    cb2 = jax.random.normal(ks[11], (Cg,), jnp.float32) * 0.1

    s1 = gamma1 / jnp.sqrt(var1 + eps)
    b1 = beta1 - mean1 * s1
    s2 = gamma2 / jnp.sqrt(var2 + eps)
    b2 = beta2 - mean2 * s2

    kernel_params = dict(
        s1=s1.reshape(-1, 1),
        b1=b1.reshape(-1, 1),
        # BN2 scale folded into conv1 weight; bf16 MXU operand.
        w1f=(w1 * s2[:, None]).astype(jnp.bfloat16),
        # conv1 bias scaled by BN2 scale + BN2 bias folded.
        b1f=(s2 * cb1 + b2).reshape(-1, 1),
        # conv2 weight reordered per tap: (ki, kj) -> leading axis; bf16.
        w2f=jnp.transpose(w2, (2, 3, 0, 1)).reshape(9, Cg, C1).astype(jnp.bfloat16),
        b2c=cb2.reshape(-1, 1),
    )
    ref_params = dict(
        s1=s1, b1=b1,
        w1_hwio=jnp.transpose(w1, (1, 0)).reshape(1, 1, in_channels, C1),
        cb1=cb1, s2=s2, b2=b2,
        w2_hwio=jnp.transpose(w2, (2, 3, 1, 0)),
        cb2=cb2,
    )
    return kernel_params, ref_params


def ref_forward_nchw(x_nchw, rp):
    x = jnp.transpose(x_nchw, (0, 2, 3, 1))                 # NHWC
    h = jnp.maximum(x * rp["s1"] + rp["b1"], 0.0)
    h = lax.conv_general_dilated(
        h, rp["w1_hwio"], (1, 1), "VALID",
        dimension_numbers=("NHWC", "HWIO", "NHWC")) + rp["cb1"]
    h = jnp.maximum(h * rp["s2"] + rp["b2"], 0.0)
    h = lax.conv_general_dilated(
        h, rp["w2_hwio"], (1, 1), "SAME",
        dimension_numbers=("NHWC", "HWIO", "NHWC")) + rp["cb2"]
    out = jnp.concatenate([h, x], axis=-1)
    return jnp.transpose(out, (0, 3, 1, 2))                 # back to NCHW


if __name__ == "__main__":
    key = jax.random.PRNGKey(0)
    kx, kp, kx2, kp2 = jax.random.split(key, 4)
    growth_rate = 4

    # Case 1: small test shape, H*W already a multiple of 128.
    N, Cin, H, W = 2, 4, 16, 16
    x = jax.random.normal(kx, (N, Cin, H, W), jnp.float32)   # torch-style NCHW
    kparams, rparams = make_params(kp, Cin, growth_rate)
    out = jax.block_until_ready(conv_block_pallas(x, kparams))
    ref = jax.block_until_ready(ref_forward_nchw(x, rparams))
    assert out.shape == (N, Cin + growth_rate, H, W), out.shape
    err = float(jnp.max(jnp.abs(out - ref)))
    assert jnp.allclose(out, ref, atol=5e-2, rtol=5e-2), err   # bf16 MXU tolerance

    # Case 2: non-lane-aligned spatial size (14*14=196 -> padded to 256).
    N2, Cin2, H2, W2 = 2, 6, 14, 14
    x2 = jax.random.normal(kx2, (N2, Cin2, H2, W2), jnp.float32)
    kparams2, rparams2 = make_params(kp2, Cin2, growth_rate)
    out2 = jax.block_until_ready(conv_block_pallas(x2, kparams2))
    ref2 = jax.block_until_ready(ref_forward_nchw(x2, rparams2))
    assert out2.shape == (N2, Cin2 + growth_rate, H2, W2), out2.shape
    err2 = float(jnp.max(jnp.abs(out2 - ref2)))
    assert jnp.allclose(out2, ref2, atol=5e-2, rtol=5e-2), err2

    print("KERNEL_OK")
</pallas_src>

<mosaic_0001>
module attributes {stable_mosaic.version = 11 : i64} {
  func.func @conv_block_kernel(%arg0: i32, %arg1: memref<1x4x256xf32, #tpu.memory_space<vmem>>, %arg2: memref<4x1xf32, #tpu.memory_space<vmem>>, %arg3: memref<4x1xf32, #tpu.memory_space<vmem>>, %arg4: memref<16x4xbf16, #tpu.memory_space<vmem>>, %arg5: memref<16x1xf32, #tpu.memory_space<vmem>>, %arg6: memref<9x4x16xbf16, #tpu.memory_space<vmem>>, %arg7: memref<4x1xf32, #tpu.memory_space<vmem>>, %arg8: memref<9x1x256xf32, #tpu.memory_space<vmem>>, %arg9: memref<1x8x256xf32, #tpu.memory_space<vmem>>) attributes {dimension_semantics = [#tpu.dimension_semantics<parallel>], iteration_bounds = array<i64: 2>, scalar_prefetch = 0 : i64, scratch_operands = 0 : i64, tpu.core_type = #tpu.core_type<tc>, window_params = [{transform_indices = @transform_0, window_bounds = array<i64: 1, 4, 256>}, {pipeline_mode = #tpu.pipeline_mode<synchronous>, transform_indices = @transform_1, window_bounds = array<i64: 4, 1>}, {pipeline_mode = #tpu.pipeline_mode<synchronous>, transform_indices = @transform_2, window_bounds = array<i64: 4, 1>}, {pipeline_mode = #tpu.pipeline_mode<synchronous>, transform_indices = @transform_3, window_bounds = array<i64: 16, 4>}, {pipeline_mode = #tpu.pipeline_mode<synchronous>, transform_indices = @transform_4, window_bounds = array<i64: 16, 1>}, {pipeline_mode = #tpu.pipeline_mode<synchronous>, transform_indices = @transform_5, window_bounds = array<i64: 9, 4, 16>}, {pipeline_mode = #tpu.pipeline_mode<synchronous>, transform_indices = @transform_6, window_bounds = array<i64: 4, 1>}, {pipeline_mode = #tpu.pipeline_mode<synchronous>, transform_indices = @transform_7, window_bounds = array<i64: 9, 1, 256>}, {transform_indices = @transform_8, window_bounds = array<i64: 1, 8, 256>}]} {
    %c0 = arith.constant 0 : index
    %c0_0 = arith.constant 0 : index
    %c0_1 = arith.constant 0 : index
    %0 = vector.load %arg1[%c0, %c0_0, %c0_1] : memref<1x4x256xf32, #tpu.memory_space<vmem>>, vector<1x4x256xf32>
    %1 = vector.shape_cast %0 : vector<1x4x256xf32> to vector<4x256xf32>
    %c0_2 = arith.constant 0 : index
    %c0_3 = arith.constant 0 : index
    %2 = vector.load %arg2[%c0_2, %c0_3] : memref<4x1xf32, #tpu.memory_space<vmem>>, vector<4x1xf32>
    %3 = vector.broadcast %2 : vector<4x1xf32> to vector<4x256xf32>
    %4 = arith.mulf %1, %3 : vector<4x256xf32>
    %c0_4 = arith.constant 0 : index
    %c0_5 = arith.constant 0 : index
    %5 = vector.load %arg3[%c0_4, %c0_5] : memref<4x1xf32, #tpu.memory_space<vmem>>, vector<4x1xf32>
    %6 = vector.broadcast %5 : vector<4x1xf32> to vector<4x256xf32>
    %7 = arith.addf %4, %6 : vector<4x256xf32>
    %cst = arith.constant 0.000000e+00 : f32
    %8 = vector.broadcast %cst : f32 to vector<4x256xf32>
    %9 = arith.maximumf %7, %8 : vector<4x256xf32>
    %c0_6 = arith.constant 0 : index
    %c0_7 = arith.constant 0 : index
    %10 = vector.load %arg4[%c0_6, %c0_7] : memref<16x4xbf16, #tpu.memory_space<vmem>>, vector<16x4xbf16>
    %11 = arith.truncf %9 : vector<4x256xf32> to vector<4x256xbf16>
    %cst_8 = arith.constant dense<0.000000e+00> : vector<16x256xf32>
    %12 = tpu.matmul %10, %11, %cst_8 {dimension_numbers = #tpu.dot_dimension_numbers<[1], [0], [0], [1], [0, 0, 1, 1], [], []>} : vector<16x4xbf16>, vector<4x256xbf16>, vector<16x256xf32> -> vector<16x256xf32>
    %c0_9 = arith.constant 0 : index
    %c0_10 = arith.constant 0 : index
    %13 = vector.load %arg5[%c0_9, %c0_10] : memref<16x1xf32, #tpu.memory_space<vmem>>, vector<16x1xf32>
    %14 = vector.broadcast %13 : vector<16x1xf32> to vector<16x256xf32>
    %15 = arith.addf %12, %14 : vector<16x256xf32>
    %cst_11 = arith.constant 0.000000e+00 : f32
    %16 = vector.broadcast %cst_11 : f32 to vector<16x256xf32>
    %17 = arith.maximumf %15, %16 : vector<16x256xf32>
    %cst_12 = arith.constant 0.000000e+00 : f32
    %18 = vector.broadcast %cst_12 : f32 to vector<4x256xf32>
    %c17_i32 = arith.constant 17 : i32
    %19 = tpu.dynamic_rotate %17 by %c17_i32 dim 1 : vector<16x256xf32>, i32 -> vector<16x256xf32>
    %c0_13 = arith.constant 0 : index
    %c0_14 = arith.constant 0 : index
    %c0_15 = arith.constant 0 : index
    %20 = vector.load %arg8[%c0_13, %c0_14, %c0_15] : memref<9x1x256xf32, #tpu.memory_space<vmem>>, vector<1x1x256xf32>
    %21 = vector.shape_cast %20 : vector<1x1x256xf32> to vector<1x256xf32>
    %22 = vector.broadcast %21 : vector<1x256xf32> to vector<16x256xf32>
    %23 = arith.mulf %19, %22 : vector<16x256xf32>
    %c0_16 = arith.constant 0 : index
    %c0_17 = arith.constant 0 : index
    %c0_18 = arith.constant 0 : index
    %24 = vector.load %arg6[%c0_16, %c0_17, %c0_18] : memref<9x4x16xbf16, #tpu.memory_space<vmem>>, vector<1x4x16xbf16>
    %25 = vector.shape_cast %24 : vector<1x4x16xbf16> to vector<4x16xbf16>
    %26 = arith.truncf %23 : vector<16x256xf32> to vector<16x256xbf16>
    %cst_19 = arith.constant dense<0.000000e+00> : vector<4x256xf32>
    %27 = tpu.matmul %25, %26, %cst_19 {dimension_numbers = #tpu.dot_dimension_numbers<[1], [0], [0], [1], [0, 0, 1, 1], [], []>} : vector<4x16xbf16>, vector<16x256xbf16>, vector<4x256xf32> -> vector<4x256xf32>
    %28 = arith.addf %18, %27 : vector<4x256xf32>
    %c16_i32 = arith.constant 16 : i32
    %29 = tpu.dynamic_rotate %17 by %c16_i32 dim 1 : vector<16x256xf32>, i32 -> vector<16x256xf32>
    %c1 = arith.constant 1 : index
    %c0_20 = arith.constant 0 : index
    %c0_21 = arith.constant 0 : index
    %30 = vector.load %arg8[%c1, %c0_20, %c0_21] : memref<9x1x256xf32, #tpu.memory_space<vmem>>, vector<1x1x256xf32>
    %31 = vector.shape_cast %30 : vector<1x1x256xf32> to vector<1x256xf32>
    %32 = vector.broadcast %31 : vector<1x256xf32> to vector<16x256xf32>
    %33 = arith.mulf %29, %32 : vector<16x256xf32>
    %c1_22 = arith.constant 1 : index
    %c0_23 = arith.constant 0 : index
    %c0_24 = arith.constant 0 : index
    %34 = vector.load %arg6[%c1_22, %c0_23, %c0_24] : memref<9x4x16xbf16, #tpu.memory_space<vmem>>, vector<1x4x16xbf16>
    %35 = vector.shape_cast %34 : vector<1x4x16xbf16> to vector<4x16xbf16>
    %36 = arith.truncf %33 : vector<16x256xf32> to vector<16x256xbf16>
    %cst_25 = arith.constant dense<0.000000e+00> : vector<4x256xf32>
    %37 = tpu.matmul %35, %36, %cst_25 {dimension_numbers = #tpu.dot_dimension_numbers<[1], [0], [0], [1], [0, 0, 1, 1], [], []>} : vector<4x16xbf16>, vector<16x256xbf16>, vector<4x256xf32> -> vector<4x256xf32>
    %38 = arith.addf %28, %37 : vector<4x256xf32>
    %c15_i32 = arith.constant 15 : i32
    %39 = tpu.dynamic_rotate %17 by %c15_i32 dim 1 : vector<16x256xf32>, i32 -> vector<16x256xf32>
    %c2 = arith.constant 2 : index
    %c0_26 = arith.constant 0 : index
    %c0_27 = arith.constant 0 : index
    %40 = vector.load %arg8[%c2, %c0_26, %c0_27] : memref<9x1x256xf32, #tpu.memory_space<vmem>>, vector<1x1x256xf32>
    %41 = vector.shape_cast %40 : vector<1x1x256xf32> to vector<1x256xf32>
    %42 = vector.broadcast %41 : vector<1x256xf32> to vector<16x256xf32>
    %43 = arith.mulf %39, %42 : vector<16x256xf32>
    %c2_28 = arith.constant 2 : index
    %c0_29 = arith.constant 0 : index
    %c0_30 = arith.constant 0 : index
    %44 = vector.load %arg6[%c2_28, %c0_29, %c0_30] : memref<9x4x16xbf16, #tpu.memory_space<vmem>>, vector<1x4x16xbf16>
    %45 = vector.shape_cast %44 : vector<1x4x16xbf16> to vector<4x16xbf16>
    %46 = arith.truncf %43 : vector<16x256xf32> to vector<16x256xbf16>
    %cst_31 = arith.constant dense<0.000000e+00> : vector<4x256xf32>
    %47 = tpu.matmul %45, %46, %cst_31 {dimension_numbers = #tpu.dot_dimension_numbers<[1], [0], [0], [1], [0, 0, 1, 1], [], []>} : vector<4x16xbf16>, vector<16x256xbf16>, vector<4x256xf32> -> vector<4x256xf32>
    %48 = arith.addf %38, %47 : vector<4x256xf32>
    %c1_i32 = arith.constant 1 : i32
    %49 = tpu.dynamic_rotate %17 by %c1_i32 dim 1 : vector<16x256xf32>, i32 -> vector<16x256xf32>
    %c3 = arith.constant 3 : index
    %c0_32 = arith.constant 0 : index
    %c0_33 = arith.constant 0 : index
    %50 = vector.load %arg8[%c3, %c0_32, %c0_33] : memref<9x1x256xf32, #tpu.memory_space<vmem>>, vector<1x1x256xf32>
    %51 = vector.shape_cast %50 : vector<1x1x256xf32> to vector<1x256xf32>
    %52 = vector.broadcast %51 : vector<1x256xf32> to vector<16x256xf32>
    %53 = arith.mulf %49, %52 : vector<16x256xf32>
    %c3_34 = arith.constant 3 : index
    %c0_35 = arith.constant 0 : index
    %c0_36 = arith.constant 0 : index
    %54 = vector.load %arg6[%c3_34, %c0_35, %c0_36] : memref<9x4x16xbf16, #tpu.memory_space<vmem>>, vector<1x4x16xbf16>
    %55 = vector.shape_cast %54 : vector<1x4x16xbf16> to vector<4x16xbf16>
    %56 = arith.truncf %53 : vector<16x256xf32> to vector<16x256xbf16>
    %cst_37 = arith.constant dense<0.000000e+00> : vector<4x256xf32>
    %57 = tpu.matmul %55, %56, %cst_37 {dimension_numbers = #tpu.dot_dimension_numbers<[1], [0], [0], [1], [0, 0, 1, 1], [], []>} : vector<4x16xbf16>, vector<16x256xbf16>, vector<4x256xf32> -> vector<4x256xf32>
    %58 = arith.addf %48, %57 : vector<4x256xf32>
    %c4 = arith.constant 4 : index
    %c0_38 = arith.constant 0 : index
    %c0_39 = arith.constant 0 : index
    %59 = vector.load %arg6[%c4, %c0_38, %c0_39] : memref<9x4x16xbf16, #tpu.memory_space<vmem>>, vector<1x4x16xbf16>
    %60 = vector.shape_cast %59 : vector<1x4x16xbf16> to vector<4x16xbf16>
    %61 = arith.truncf %17 : vector<16x256xf32> to vector<16x256xbf16>
    %cst_40 = arith.constant dense<0.000000e+00> : vector<4x256xf32>
    %62 = tpu.matmul %60, %61, %cst_40 {dimension_numbers = #tpu.dot_dimension_numbers<[1], [0], [0], [1], [0, 0, 1, 1], [], []>} : vector<4x16xbf16>, vector<16x256xbf16>, vector<4x256xf32> -> vector<4x256xf32>
    %63 = arith.addf %58, %62 : vector<4x256xf32>
    %c255_i32 = arith.constant 255 : i32
    %64 = tpu.dynamic_rotate %17 by %c255_i32 dim 1 : vector<16x256xf32>, i32 -> vector<16x256xf32>
    %c5 = arith.constant 5 : index
    %c0_41 = arith.constant 0 : index
    %c0_42 = arith.constant 0 : index
    %65 = vector.load %arg8[%c5, %c0_41, %c0_42] : memref<9x1x256xf32, #tpu.memory_space<vmem>>, vector<1x1x256xf32>
    %66 = vector.shape_cast %65 : vector<1x1x256xf32> to vector<1x256xf32>
    %67 = vector.broadcast %66 : vector<1x256xf32> to vector<16x256xf32>
    %68 = arith.mulf %64, %67 : vector<16x256xf32>
    %c5_43 = arith.constant 5 : index
    %c0_44 = arith.constant 0 : index
    %c0_45 = arith.constant 0 : index
    %69 = vector.load %arg6[%c5_43, %c0_44, %c0_45] : memref<9x4x16xbf16, #tpu.memory_space<vmem>>, vector<1x4x16xbf16>
    %70 = vector.shape_cast %69 : vector<1x4x16xbf16> to vector<4x16xbf16>
    %71 = arith.truncf %68 : vector<16x256xf32> to vector<16x256xbf16>
    %cst_46 = arith.constant dense<0.000000e+00> : vector<4x256xf32>
    %72 = tpu.matmul %70, %71, %cst_46 {dimension_numbers = #tpu.dot_dimension_numbers<[1], [0], [0], [1], [0, 0, 1, 1], [], []>} : vector<4x16xbf16>, vector<16x256xbf16>, vector<4x256xf32> -> vector<4x256xf32>
    %73 = arith.addf %63, %72 : vector<4x256xf32>
    %c241_i32 = arith.constant 241 : i32
    %74 = tpu.dynamic_rotate %17 by %c241_i32 dim 1 : vector<16x256xf32>, i32 -> vector<16x256xf32>
    %c6 = arith.constant 6 : index
    %c0_47 = arith.constant 0 : index
    %c0_48 = arith.constant 0 : index
    %75 = vector.load %arg8[%c6, %c0_47, %c0_48] : memref<9x1x256xf32, #tpu.memory_space<vmem>>, vector<1x1x256xf32>
    %76 = vector.shape_cast %75 : vector<1x1x256xf32> to vector<1x256xf32>
    %77 = vector.broadcast %76 : vector<1x256xf32> to vector<16x256xf32>
    %78 = arith.mulf %74, %77 : vector<16x256xf32>
    %c6_49 = arith.constant 6 : index
    %c0_50 = arith.constant 0 : index
    %c0_51 = arith.constant 0 : index
    %79 = vector.load %arg6[%c6_49, %c0_50, %c0_51] : memref<9x4x16xbf16, #tpu.memory_space<vmem>>, vector<1x4x16xbf16>
    %80 = vector.shape_cast %79 : vector<1x4x16xbf16> to vector<4x16xbf16>
    %81 = arith.truncf %78 : vector<16x256xf32> to vector<16x256xbf16>
    %cst_52 = arith.constant dense<0.000000e+00> : vector<4x256xf32>
    %82 = tpu.matmul %80, %81, %cst_52 {dimension_numbers = #tpu.dot_dimension_numbers<[1], [0], [0], [1], [0, 0, 1, 1], [], []>} : vector<4x16xbf16>, vector<16x256xbf16>, vector<4x256xf32> -> vector<4x256xf32>
    %83 = arith.addf %73, %82 : vector<4x256xf32>
    %c240_i32 = arith.constant 240 : i32
    %84 = tpu.dynamic_rotate %17 by %c240_i32 dim 1 : vector<16x256xf32>, i32 -> vector<16x256xf32>
    %c7 = arith.constant 7 : index
    %c0_53 = arith.constant 0 : index
    %c0_54 = arith.constant 0 : index
    %85 = vector.load %arg8[%c7, %c0_53, %c0_54] : memref<9x1x256xf32, #tpu.memory_space<vmem>>, vector<1x1x256xf32>
    %86 = vector.shape_cast %85 : vector<1x1x256xf32> to vector<1x256xf32>
    %87 = vector.broadcast %86 : vector<1x256xf32> to vector<16x256xf32>
    %88 = arith.mulf %84, %87 : vector<16x256xf32>
    %c7_55 = arith.constant 7 : index
    %c0_56 = arith.constant 0 : index
    %c0_57 = arith.constant 0 : index
    %89 = vector.load %arg6[%c7_55, %c0_56, %c0_57] : memref<9x4x16xbf16, #tpu.memory_space<vmem>>, vector<1x4x16xbf16>
    %90 = vector.shape_cast %89 : vector<1x4x16xbf16> to vector<4x16xbf16>
    %91 = arith.truncf %88 : vector<16x256xf32> to vector<16x256xbf16>
    %cst_58 = arith.constant dense<0.000000e+00> : vector<4x256xf32>
    %92 = tpu.matmul %90, %91, %cst_58 {dimension_numbers = #tpu.dot_dimension_numbers<[1], [0], [0], [1], [0, 0, 1, 1], [], []>} : vector<4x16xbf16>, vector<16x256xbf16>, vector<4x256xf32> -> vector<4x256xf32>
    %93 = arith.addf %83, %92 : vector<4x256xf32>
    %c239_i32 = arith.constant 239 : i32
    %94 = tpu.dynamic_rotate %17 by %c239_i32 dim 1 : vector<16x256xf32>, i32 -> vector<16x256xf32>
    %c8 = arith.constant 8 : index
    %c0_59 = arith.constant 0 : index
    %c0_60 = arith.constant 0 : index
    %95 = vector.load %arg8[%c8, %c0_59, %c0_60] : memref<9x1x256xf32, #tpu.memory_space<vmem>>, vector<1x1x256xf32>
    %96 = vector.shape_cast %95 : vector<1x1x256xf32> to vector<1x256xf32>
    %97 = vector.broadcast %96 : vector<1x256xf32> to vector<16x256xf32>
    %98 = arith.mulf %94, %97 : vector<16x256xf32>
    %c8_61 = arith.constant 8 : index
    %c0_62 = arith.constant 0 : index
    %c0_63 = arith.constant 0 : index
    %99 = vector.load %arg6[%c8_61, %c0_62, %c0_63] : memref<9x4x16xbf16, #tpu.memory_space<vmem>>, vector<1x4x16xbf16>
    %100 = vector.shape_cast %99 : vector<1x4x16xbf16> to vector<4x16xbf16>
    %101 = arith.truncf %98 : vector<16x256xf32> to vector<16x256xbf16>
    %cst_64 = arith.constant dense<0.000000e+00> : vector<4x256xf32>
    %102 = tpu.matmul %100, %101, %cst_64 {dimension_numbers = #tpu.dot_dimension_numbers<[1], [0], [0], [1], [0, 0, 1, 1], [], []>} : vector<4x16xbf16>, vector<16x256xbf16>, vector<4x256xf32> -> vector<4x256xf32>
    %103 = arith.addf %93, %102 : vector<4x256xf32>
    %c0_65 = arith.constant 0 : index
    %c0_66 = arith.constant 0 : index
    %104 = vector.load %arg7[%c0_65, %c0_66] : memref<4x1xf32, #tpu.memory_space<vmem>>, vector<4x1xf32>
    %105 = vector.broadcast %104 : vector<4x1xf32> to vector<4x256xf32>
    %106 = arith.addf %103, %105 : vector<4x256xf32>
    %c0_67 = arith.constant 0 : index
    %c0_68 = arith.constant 0 : index
    %c0_69 = arith.constant 0 : index
    %107 = vector.load %arg9[%c0_67, %c0_68, %c0_69] : memref<1x8x256xf32, #tpu.memory_space<vmem>>, vector<1x4x256xf32>
    %108 = vector.shape_cast %107 : vector<1x4x256xf32> to vector<4x256xf32>
    %109 = vector.shape_cast %106 : vector<4x256xf32> to vector<1x4x256xf32>
    tpu.vector_store %arg9[%c0_67, %c0_68, %c0_69], %109 {strides = array<i32>} : memref<1x8x256xf32, #tpu.memory_space<vmem>>, vector<1x4x256xf32>,
    %c0_70 = arith.constant 0 : index
    %c4_71 = arith.constant 4 : index
    %c0_72 = arith.constant 0 : index
    %110 = vector.load %arg9[%c0_70, %c4_71, %c0_72] : memref<1x8x256xf32, #tpu.memory_space<vmem>>, vector<1x4x256xf32>
    %111 = vector.shape_cast %110 : vector<1x4x256xf32> to vector<4x256xf32>
    %112 = vector.shape_cast %1 : vector<4x256xf32> to vector<1x4x256xf32>
    tpu.vector_store %arg9[%c0_70, %c4_71, %c0_72], %112 {strides = array<i32>} : memref<1x8x256xf32, #tpu.memory_space<vmem>>, vector<1x4x256xf32>,
    return
  }
  func.func @transform_0(%arg0: i32) -> (i32, i32, i32) {
    %c0_i32 = arith.constant 0 : i32
    %c0_i32_0 = arith.constant 0 : i32
    %c0_i32_1 = arith.constant 0 : i32
    return %arg0, %c0_i32, %c0_i32_0 : i32, i32, i32
  }
  func.func @transform_1(%arg0: i32) -> (i32, i32) {
    %c0_i32 = arith.constant 0 : i32
    %c0_i32_0 = arith.constant 0 : i32
    %c0_i32_1 = arith.constant 0 : i32
    return %c0_i32, %c0_i32_0 : i32, i32
  }
  func.func @transform_2(%arg0: i32) -> (i32, i32) {
    %c0_i32 = arith.constant 0 : i32
    %c0_i32_0 = arith.constant 0 : i32
    %c0_i32_1 = arith.constant 0 : i32
    return %c0_i32, %c0_i32_0 : i32, i32
  }
  func.func @transform_3(%arg0: i32) -> (i32, i32) {
    %c0_i32 = arith.constant 0 : i32
    %c0_i32_0 = arith.constant 0 : i32
    %c0_i32_1 = arith.constant 0 : i32
    return %c0_i32, %c0_i32_0 : i32, i32
  }
  func.func @transform_4(%arg0: i32) -> (i32, i32) {
    %c0_i32 = arith.constant 0 : i32
    %c0_i32_0 = arith.constant 0 : i32
    %c0_i32_1 = arith.constant 0 : i32
    return %c0_i32, %c0_i32_0 : i32, i32
  }
  func.func @transform_5(%arg0: i32) -> (i32, i32, i32) {
    %c0_i32 = arith.constant 0 : i32
    %c0_i32_0 = arith.constant 0 : i32
    %c0_i32_1 = arith.constant 0 : i32
    %c0_i32_2 = arith.constant 0 : i32
    return %c0_i32, %c0_i32_0, %c0_i32_1 : i32, i32, i32
  }
  func.func @transform_6(%arg0: i32) -> (i32, i32) {
    %c0_i32 = arith.constant 0 : i32
    %c0_i32_0 = arith.constant 0 : i32
    %c0_i32_1 = arith.constant 0 : i32
    return %c0_i32, %c0_i32_0 : i32, i32
  }
  func.func @transform_7(%arg0: i32) -> (i32, i32, i32) {
    %c0_i32 = arith.constant 0 : i32
    %c0_i32_0 = arith.constant 0 : i32
    %c0_i32_1 = arith.constant 0 : i32
    %c0_i32_2 = arith.constant 0 : i32
    return %c0_i32, %c0_i32_0, %c0_i32_1 : i32, i32, i32
  }
  func.func @transform_8(%arg0: i32) -> (i32, i32, i32) {
    %c0_i32 = arith.constant 0 : i32
    %c0_i32_0 = arith.constant 0 : i32
    %c0_i32_1 = arith.constant 0 : i32
    return %arg0, %c0_i32, %c0_i32_0 : i32, i32, i32
  }
}

</mosaic_0001>

<bundles_post_ra>
// kernel: tpu_custom_call.1
= control target key start
LH: loop header
LB: loop body
LE: loop exit
PB: predicated region body
PF: predicated region fallthrough
CT: control target
= control target key end

     0   :  { %13 = vsyncpa [#allocation3], 0  ;;  %s1916_s0 = inlined_call_operand.hbm [shape: f32[2,4,256], index: 0, kind: input, shape index: {}]   ;;  %s1917_s1 = inlined_call_operand.vmem [shape: f32[4,1], index: 1, kind: input, shape index: {}]   ;;  %s1918_s2 = inlined_call_operand.vmem [shape: f32[4,1], index: 2, kind: input, shape index: {}]   ;;  %s1919_s3 = inlined_call_operand.vmem [shape: bf16[16,4], index: 3, kind: input, shape index: {}]   ;;  %s1920_s4 = inlined_call_operand.vmem [shape: f32[16,1], index: 4, kind: input, shape index: {}]   ;;  %s1921_s5 = inlined_call_operand.vmem [shape: bf16[9,4,16], index: 5, kind: input, shape index: {}]   ;;  %s1922_s6 = inlined_call_operand.vmem [shape: f32[4,1], index: 6, kind: input, shape index: {}]   ;;  %s1923_s7 = inlined_call_operand.vmem [shape: f32[9,1,256], index: 7, kind: input, shape index: {}]   ;;  %s1924_s8 = inlined_call_operand.hbm [shape: f32[2,8,256], index: 8, kind: output, shape index: {}]  }
   0x1   :  { %15 = vsyncpa [#allocation3 + $0x1], 0 }
   0x2   :  { %16 = vsyncpa [#allocation4], 0 }
   0x3   :  { %18 = vsyncpa [#allocation4 + $0x1], 0  ;;  %s1476_s27 = smov 0   ;;  %s1478_s28 = smov 0  }
   0x4   :  { %s1480_s29 = smov 0   ;;  %s1482_s30 = smov 0  }
   0x5 LB: > { %s1497_s9 = sadd.s32 4294967295, %s1417_s30   ;;  %s1222_s10 = sadd.s32 4294967294, %s1417_s30   ;;  %s1417_s30 = sphi %s1482_s30, %s1943_s30   ;;  %s1413_s29 = sphi %s1480_s29, %s1942_s29   ;;  %s1409_s28 = sphi %s1478_s28, %s1941_s28   ;;  %s1405_s27 = sphi %s1476_s27, %s1940_s27  }
   0x6   : > { %s1501_s11 = sadd.s32 1, %s1417_s30   ;;  %s31_s12 = sadd.s32 1, %s1413_s29 }
   0x7   : > { %s28_s13 = ssub.s32 %s1417_s30, %s1501_s11  ;;  %p38_p0 = scmp.ne.s32.totalorder %s1413_s29, %s1409_s28 }
   0x8   : > { %p29_p1 = scmp.eq.s32.totalorder %s28_s13, 0  ;;  %p39_p2 = scmp.eq.s32.totalorder %s1417_s30, 0 }
   0x9   : > { %p44_p3 = scmp.ne.s32.totalorder %s1409_s28, %s1405_s27  ;;  %p45_p4 = scmp.eq.s32.totalorder %s1497_s9, 0 }
   0xa   : > { %s1513_s14 = scalar_select %p29_p1, %s1413_s29, %s31_s12  }
   0xb   : > { %p1515_p5 = por %p39_p2, %p38_p0  ;;  %p1519_p6 = por %p45_p4, %p44_p3 }
   0xc   : > { %1927 = sst [smem:[#allocation8_spill]] %s1513_s14  ;;  %p215_p7 = scmp.eq.s32.totalorder %s1497_s9, 1 }
   0xd   : > { %s1929_s16 = scalar_select %p1519_p6, 1, 0 }
   0xe   : > { %p221_p8 = scmp.eq.s32.totalorder %s1222_s10, 1  ;;  %p1277_p10 = scmp.lt.s32.totalorder %s1417_s30, 2 }
   0xf   : > { %p1526_p11 = por %p215_p7, %p38_p0  ;;  %s262_s19 = sand.u32 1, %s1413_s29  }
  0x10   : > { %p1530_p12 = por %p221_p8, %p44_p3  ;;  %s1263_s20 = sshll.u32 %s1417_s30, 7 }
  0x11   : > { %s1930_s17 = scalar_select %p1526_p11, 1, 0 }
  0x12   : > { %s1931_s18 = scalar_select %p1530_p12, 1, 0 }
  0x13   : > { %s1225_s21 = sshll.u32 %s262_s19, 3  ;;  %s1539_s24 = scalar_lea.hbm %s1916_s0, %s1263_s20 }
  0x14   : > { %s266_s25 = scalar_lea.vmem [#allocation2], %s1225_s21  ;;  %p1543_p13 = pnand %p1277_p10, %p1515_p5 }
  0x15   : > { %s274_s26 = sshll.u32 %s266_s25, 4  ;;  %s263_s12 = scalar_lea.sflag [#allocation3], %s262_s19  ;;  %s1547_s26 = int_to_ptr.vmem [resolvable:$true] %s274_s26 }
  0x16   : > { %s1325_s13 = scalar_lea.hbm %s1539_s24, 128  ;;  %p1327_p3 = pneg %p1543_p13 }
  0x17   : > { %p1326_p2 = scmp.ne.s32.totalorder %s1539_s24, %s1325_s13  ;;  %s1330_s15 = scalar_lea.hbm %s1916_s0, 256 }
  0x18   : > { %p1331_p5 = scmp.lt.s32.totalorder %s1539_s24, %s1916_s0  ;;  %p1332_p8 = scmp.lt.s32.totalorder %s1330_s15, %s1325_s13 }
  0x19   : > { %p1328_p4 = pnand %p1327_p3, %p1326_p2 }
  0x1a   : > { %p1333_p10 = por %p1332_p8, %p1331_p5 }
  0x1b   : > { %p1329_p7 = pneg %p1328_p4 }
  0x1d   : > { %p1334_p9 = pnand %p1333_p10, %p1329_p7 }
  0x1f   : > { %1337 = shalt.err (!%p1334_p9)
}
  0x20   : > { %s1338_s19 = scalar_lea.vmem %s1547_s26, 128  ;;  %s1419_s25 = smov [#allocation2]  }
  0x21   : > { %p1339_p0 = scmp.ne.s32.totalorder %s1547_s26, %s1338_s19  ;;  %s1343_s14 = sshll.u32 %s1419_s25, 4  ;;  %s1344_s14 = int_to_ptr.vmem [resolvable:$false] %s1343_s14 }
  0x22   : > { %s1345_s20 = scalar_lea.vmem %s1344_s14, 256  ;;  %p1346_p4 = scmp.lt.s32.totalorder %s1547_s26, %s1344_s14 }
  0x23   : > { %p1341_p1 = pnand %p1339_p0, %p1327_p3  ;;  %p1347_p12 = scmp.lt.s32.totalorder %s1345_s20, %s1338_s19 }
  0x25   : > { %p1342_p2 = pneg %p1341_p1  ;;  %p1348_p11 = por %p1347_p12, %p1346_p4 }
  0x27   : > { %p1349_p6 = pnand %p1348_p11, %p1342_p2 }
  0x29   : > { %1352 = shalt.err (!%p1349_p6)
}
  0x2a   : > { %1272 = dma.hbm_to_vmem [thread:$0]  (!%p1543_p13), %s1539_s24, 128, %s1547_s26, %s263_s12  }
  0x2b   : > { %p1933_p9 = scmp.lt.s32.totalorder %s1417_s30, 3  ;;  %p1934_p7 = scmp.ge.s32.totalorder %s1417_s30, 1 }
  0x2d   : > { %p280_p0 = pnand %p1934_p7, %p1933_p9 }
  0x2e   : > { %s1574_s13 = sand.u32 (!%p280_p0), 1, %s1409_s28   ;;  %p1935_p6 = scmp.ne.s32.totalorder (!%p280_p0), %s1929_s16, 0 }
  0x2f   : > { %283 = sbr.rel (%p280_p0) target bundleno = 795 (0x31b), region = 52  ;;  %s1229_s14 = sshll.u32 (!%p280_p0), %s1574_s13, 3 }
  0x30   : > { %s286_s21 = scalar_lea.sflag (!%p280_p0), [#allocation3], %s1574_s13  ;;  %s289_s15 = scalar_lea.vmem (!%p280_p0), [#allocation2], %s1229_s14 }
  0x34   : > { %1396 = dma.done.wait (%p1935_p6), %s286_s21, 128  }
  0x35   : > { %1398 = vsyncadd (%p1935_p6), %s286_s21, 4294967168  ;;  %v1420_v0 = vmov 0   ;;  %s1230_s24 = sshll.u32 %s1574_s13, 4  ;;  %v324_v1 = vld [vmem:[%s1917_s1] sm:$0xf]  ;;  %v361_v6 = vld [vmem:[%s1920_s4 + $0x8] sm:$0xff]  ;;  %v332_v9 = vlaneseq }
  0x36   : > { %1321 = vset.pattern.permute.xlu0 %v1420_v0  ;;  %420 = vmatprep.mubr.bf16.mxu0 %v1420_v0  ;;  %v323_v2 = vld [vmem:[%s289_s15] sm:$0xff]  ;;  %s1590_s16 = scalar_lea.vmem [#allocation5], %s1230_s24  ;;  %v1421_v7 = vmov 839922192   ;;  %vm381_vm0 = vcmask 1041408   ;;  %vm377_vm1 = vcmask 31744  }
  0x37   : > { %1322 = vset.pattern.permute.xlu1 %v1420_v0  ;;  %539 = vmatprep.mubr.bf16.mxu1 %v1420_v0  ;;  %v1133_v3 = vcombine.low %v323_v2, %v323_v2  ;;  %1136 = vst [vmem:[%s1590_s16 + $0x8] sm:$0xf0] %v323_v2  ;;  %v338_v4 = vld [vmem:[%s1918_s2] sm:$0xf]  ;;  %v330_v8 = vunpack.c.l.s4 %v1421_v7  ;;  %v1604_v11 = vshrl.u32 %v332_v9, 7  ;;  %s1422_s15 = smov 16  }
  0x38   : > { %327 = vperm.xlu0 %1321, %v324_v1   ;;  %v360_v5 = vld [vmem:[%s1920_s4] sm:$0xff]  ;;  %s1423_s24 = smov 17   ;;  %s1424_s26 = smov 15   ;;  %v1671_v53 = vand.u32 127, %v332_v9  ;;  %vm503_vm6 = vcmask 130048  }
  0x39   : > { %1135 = vst [vmem:[%s1590_s16] sm:$0xf0] %v1133_v3  ;;  %364 = vperm.xlu1 %1322, %v360_v5   ;;  %v331_v10 = vunpack.c.0.s8 %v330_v8  ;;  %v1324_v24 = vld [vmem:[%s1919_s3] sm:$0xff]   ;;  %s1425_s10 = smov 1   ;;  %s1426_s12 = smov 127   ;;  %v1674_v54 = vsub.s32 0, %v1604_v11  ;;  %v1677_v55 = vsub.s32 1, %v1604_v11 }
  0x3a   : > { %s1427_s22 = smov 113   ;;  %s1428_s23 = smov 112   ;;  %v1122_v41 = vld [vmem:[%s1922_s6] sm:$0xf]  ;;  %vm477_vm2 = vcmp.lt.s32.totalorder %v1671_v53, 16  ;;  %vm445_vm3 = vcmp.lt.s32.totalorder %v1671_v53, 17 }
  0x3b   : > { %v334_v12 = vsub.s32 %v331_v10, %v1604_v11  ;;  %s1429_s19 = smov 111   ;;  %v1234_v56 = vld [vmem:[%s1923_s7 + $0x2] sm:$0x3]  ;;  %v450_v61 = vld [vmem:[%s1923_s7] sm:$0x3]  ;;  %vm600_vm4 = vcmp.lt.s32.totalorder %v1671_v53, 15 }
  0x3c   : > { %341 = vperm.xlu0 %1321, %v338_v4   ;;  %v488_v59 = vrot.slane %v1234_v56, %v1674_v54  ;;  %v492_v60 = vrot.slane %v1234_v56, %v1677_v55  ;;  %v1238_v3 = vld [vmem:[%s1923_s7 + $0x4] sm:$0x3]  ;;  %v455_v5 = vrot.slane %v450_v61, %v1674_v54  ;;  %vm680_vm5 = vcmp.lt.s32.totalorder %v1671_v53, 1  ;;  %s1264_s25 = sshll.u32 %s1497_s9, 8  ;;  %s1152_s20 = sshll.u32 %s1590_s16, 4  ;;  %s1153_s20 = int_to_ptr.vmem [resolvable:$true] %s1152_s20 }
  0x3d   : > { %369 = vperm.xlu1 %1322, %v361_v6   ;;  %v459_v6 = vrot.slane %v450_v61, %v1677_v55  ;;  %v611_v10 = vrot.slane %v1238_v3, %v1674_v54  ;;  %v615_v11 = vrot.slane %v1238_v3, %v1677_v55  ;;  %v1246_v3 = vld [vmem:[%s1923_s7 + $0xa] sm:$0x3]  ;;  %vm810_vm7 = vcmp.lt.s32.totalorder %v1671_v53, 127  ;;  %p1936_p12 = scmp.ne.s32.totalorder %s1930_s17, 0  ;;  %s1430_s9 = smov [#allocation5]  }
  0x3e   : > { %vm890_vm8 = vcmp.lt.s32.totalorder %v1671_v53, 113  ;;  %vm970_vm9 = vcmp.lt.s32.totalorder %v1671_v53, 112  ;;  %vm1050_vm10 = vcmp.lt.s32.totalorder %v1671_v53, 111  ;;  %v1256_v53 = vld [vmem:[%s1921_s5 + $0x10] sm:$0x3] }
  0xb3   : > { %v328_v13 = vpop.permute.xlu0 %327 }
  0xb4   : > { %v335_v14 = vrot.slane %v328_v13, %v334_v12  ;;  %v365_v25 = vpop.permute.xlu1 %364 }
  0xb6   : > { %v337_v16 = vmul.f32 %v335_v14, %v323_v2 }
  0xb7   : > { %v342_v15 = vpop.permute.xlu0 %341 }
  0xb8   : > { %v349_v17 = vrot.slane %v342_v15, %v334_v12  ;;  %v370_v30 = vpop.permute.xlu1 %369 }
  0xba   : > { %v351_v18 = vadd.f32 %v349_v17, %v337_v16  ;;  %v1241_v16 = vld [vmem:[%s1923_s7 + $0x6] sm:$0x3] }
  0xbc   : > { %v352_v19 = vmax.f32 %v351_v18, 0.0 }
  0xbe   : > { %v356_v20 = vcombine.high %v352_v19, %v352_v19  ;;  %v358_v21 = vpack.c.bf16 %v352_v19, %v352_v19 }
  0xc0   : > { %v359_v22 = vpack.c.bf16 %v356_v20, %v356_v20  ;;  %v383_v23 = vsel %vm381_vm0, %v358_v21, 0 }
  0xc2   : > { %1232 = vmatprep.subr.msk.bf16.mxu0 %vm381_vm0, %v359_v22 }
  0xc3   : > { %403 = vmatpush1.bf16.msra.mxu0 %v383_v23 }
  0xc6   : > { %1233 = vmatmul.mubr.msk.bf16.vlgmr.msra.gmra.mxu0 %vm377_vm1, %v1324_v24 }
  0xc7   : > { %583 = vmatprep.mubr.bf16.mxu0 %v1420_v0 }
 0x186   : > { %v422_v26 = vpop.f32.mrf.mxu0 }
 0x187   : > { %v423_v27 = vadd.f32 %v422_v26, %v365_v25  ;;  %v695_v26 = vrot.slane %v1241_v16, %v1677_v55 }
 0x188   : > { %v424_v28 = vpop.f32.mrf.mxu0 }
 0x189   : > { %v1611_v29 = vmax.f32 %v423_v27, 0.0  ;;  %v425_v32 = vadd.f32 %v424_v28, %v365_v25  ;;  %v691_v25 = vrot.slane %v1241_v16, %v1674_v54 }
 0x18a   : > { %v426_v31 = vpop.f32.mrf.mxu0 }
 0x18b   : > { %v427_v33 = vadd.f32 %v426_v31, %v370_v30  ;;  %469 = vrot.lane.b32.xlu0 %v1611_v29, %s1422_s15  ;;  %v1616_v37 = vmax.f32 %v425_v32, 0.0 }
 0x18c   : > { %v428_v34 = vpop.f32.mrf.mxu0 }
 0x18d   : > { %v1614_v35 = vmax.f32 %v427_v33, 0.0  ;;  %v429_v36 = vadd.f32 %v428_v34, %v370_v30 }
 0x18f   : > { %v1618_v38 = vmax.f32 %v429_v36, 0.0  ;;  %471 = vrot.lane.b32.xlu1 %v1614_v35, %s1422_s15  ;;  %435 = vrot.lane.b32.xlu0 %v1611_v29, %s1423_s24  ;;  %v754_v39 = vpack.c.bf16 %v1614_v35, %v1611_v29 }
 0x191   : > { %v755_v40 = vpack.c.bf16 %v1618_v38, %v1616_v37 }
 0x193   : > { %437 = vrot.lane.b32.xlu1 %v1614_v35, %s1423_s24  ;;  %592 = vrot.lane.b32.xlu0 %v1611_v29, %s1424_s26 }
 0x197   : > { %594 = vrot.lane.b32.xlu1 %v1614_v35, %s1424_s26  ;;  %672 = vrot.lane.b32.xlu0 %v1611_v29, %s1425_s10 }
 0x19b   : > { %674 = vrot.lane.b32.xlu1 %v1614_v35, %s1425_s10  ;;  %802 = vrot.lane.b32.xlu0 %v1611_v29, %s1426_s12 }
 0x19f   : > { %804 = vrot.lane.b32.xlu1 %v1614_v35, %s1426_s12  ;;  %882 = vrot.lane.b32.xlu0 %v1611_v29, %s1427_s22 }
 0x1a3   : > { %884 = vrot.lane.b32.xlu1 %v1614_v35, %s1427_s22  ;;  %962 = vrot.lane.b32.xlu0 %v1611_v29, %s1428_s23 }
 0x1a7   : > { %964 = vrot.lane.b32.xlu1 %v1614_v35, %s1428_s23  ;;  %473 = vrot.lane.b32.xlu0 %v1616_v37, %s1422_s15 }
 0x1ab   : > { %475 = vrot.lane.b32.xlu1 %v1618_v38, %s1422_s15  ;;  %439 = vrot.lane.b32.xlu0 %v1616_v37, %s1423_s24  ;;  %s1878_s15 = scalar_lea.hbm %s1924_s8, %s1264_s25 }
 0x1af   : > { %441 = vrot.lane.b32.xlu1 %v1618_v38, %s1423_s24  ;;  %596 = vrot.lane.b32.xlu0 %v1616_v37, %s1424_s26  ;;  %s1138_s24 = scalar_lea.sflag [#allocation4], %s1574_s13 }
 0x1b3   : > { %598 = vrot.lane.b32.xlu1 %v1618_v38, %s1424_s26  ;;  %676 = vrot.lane.b32.xlu0 %v1616_v37, %s1425_s10  ;;  %s1353_s26 = scalar_lea.vmem %s1153_s20, 256 }
 0x1b4   : > { %p1354_p11 = scmp.ne.s32.totalorder %s1153_s20, %s1353_s26 }
 0x1b6   : > { %p1355_p13 = pnand %p1354_p11, %p1936_p12 }
 0x1b7   : > { %678 = vrot.lane.b32.xlu1 %v1618_v38, %s1425_s10  ;;  %1042 = vrot.lane.b32.xlu0 %v1611_v29, %s1429_s19  ;;  %s1357_s10 = sshll.u32 %s1430_s9, 4  ;;  %s1358_s10 = int_to_ptr.vmem [resolvable:$false] %s1357_s10 }
 0x1b8   : > { %p1356_p1 = pneg %p1355_p13  ;;  %p1360_p3 = scmp.lt.s32.totalorder %s1153_s20, %s1358_s10 }
 0x1bb   : > { %1044 = vrot.lane.b32.xlu1 %v1614_v35, %s1429_s19  ;;  %806 = vrot.lane.b32.xlu0 %v1616_v37, %s1426_s12 }
 0x1bf   : > { %808 = vrot.lane.b32.xlu1 %v1618_v38, %s1426_s12  ;;  %886 = vrot.lane.b32.xlu0 %v1616_v37, %s1427_s22  ;;  %s1359_s12 = scalar_lea.vmem %s1358_s10, 512 }
 0x1c0   : > { %p1361_p5 = scmp.lt.s32.totalorder %s1359_s12, %s1353_s26 }
 0x1c2   : > { %p1362_p8 = por %p1361_p5, %p1360_p3 }
 0x1c3   : > { %888 = vrot.lane.b32.xlu1 %v1618_v38, %s1427_s22  ;;  %966 = vrot.lane.b32.xlu0 %v1616_v37, %s1428_s23 }
 0x1c4   : > { %p1363_p10 = pnand %p1362_p8, %p1356_p1 }
 0x1c7   : > { %968 = vrot.lane.b32.xlu1 %v1618_v38, %s1428_s23  ;;  %1046 = vrot.lane.b32.xlu0 %v1616_v37, %s1429_s19 }
 0x1cb   : > { %1048 = vrot.lane.b32.xlu1 %v1618_v38, %s1429_s19  ;;  %1125 = vperm.xlu0 %1321, %v1122_v41   ;;  %v1235_v41 = vld [vmem:[%s1921_s5 + $0x2] sm:$0x3] }
 0x1fd   : > { %v470_v42 = vpop.permute.xlu0 %469 }
 0x201   : > { %v472_v43 = vpop.permute.xlu1 %471  ;;  %v436_v44 = vpop.permute.xlu0 %435 }
 0x205   : > { %v438_v45 = vpop.permute.xlu1 %437  ;;  %v593_v46 = vpop.permute.xlu0 %592 }
 0x209   : > { %v1658_v47 = vpop.permute.xlu1 %594  ;;  %v1660_v48 = vpop.permute.xlu0 %672 }
 0x20d   : > { %v1662_v49 = vpop.permute.xlu1 %674  ;;  %v1664_v50 = vpop.permute.xlu0 %802 }
 0x211   : > { %v1666_v51 = vpop.permute.xlu1 %804  ;;  %v1668_v52 = vpop.permute.xlu0 %882 }
 0x215   : > { %v1682_v57 = vpop.permute.xlu1 %884  ;;  %v1684_v58 = vpop.permute.xlu0 %962 }
 0x219   : > { %v1692_v62 = vpop.permute.xlu1 %964  ;;  %v474_v63 = vpop.permute.xlu0 %473 }
 0x21a   : > { %v478_v1 = vsel %vm477_vm2, %v470_v42, %v474_v63  ;;  %v480_v2 = vsel %vm477_vm2, %v474_v63, %v470_v42 }
 0x21b   : > { %v495_v4 = vmul.f32 %v488_v59, %v480_v2  ;;  %v496_v7 = vmul.f32 %v492_v60, %v478_v1 }
 0x21d   : > { %v476_v8 = vpop.permute.xlu1 %475  ;;  %v440_v9 = vpop.permute.xlu0 %439 }
 0x21e   : > { %v479_v12 = vsel %vm477_vm2, %v472_v43, %v476_v8  ;;  %v481_v13 = vsel %vm477_vm2, %v476_v8, %v472_v43  ;;  %v446_v14 = vsel %vm445_vm3, %v436_v44, %v440_v9  ;;  %v448_v15 = vsel %vm445_vm3, %v440_v9, %v436_v44 }
 0x21f   : > { %v497_v17 = vmul.f32 %v488_v59, %v481_v13  ;;  %v462_v18 = vmul.f32 %v455_v5, %v448_v15  ;;  %v463_v19 = vmul.f32 %v459_v6, %v446_v14  ;;  %v498_v20 = vmul.f32 %v492_v60, %v479_v12  ;;  %v1249_v13 = vld [vmem:[%s1923_s7 + $0xc] sm:$0x3] }
 0x220   : > { %v825_v12 = vrot.slane %v1246_v3, %v1677_v55 }
 0x221   : > { %v442_v21 = vpop.permute.xlu1 %441  ;;  %v597_v22 = vpop.permute.xlu0 %596  ;;  %v502_v23 = vpack.c.bf16 %v498_v20, %v496_v7  ;;  %v501_v24 = vpack.c.bf16 %v497_v17, %v495_v4  ;;  %v901_v20 = vrot.slane %v1249_v13, %v1674_v54 }
 0x222   : > { %v447_v27 = vsel %vm445_vm3, %v438_v45, %v442_v21  ;;  %v449_v28 = vsel %vm445_vm3, %v442_v21, %v438_v45  ;;  %v601_v30 = vsel %vm600_vm4, %v593_v46, %v597_v22  ;;  %v603_v31 = vsel %vm600_vm4, %v597_v22, %v593_v46  ;;  %v1252_v21 = vld [vmem:[%s1923_s7 + $0xe] sm:$0x3] }
 0x223   : > { %v464_v32 = vmul.f32 %v455_v5, %v449_v28  ;;  %v465_v33 = vmul.f32 %v459_v6, %v447_v27  ;;  %v618_v34 = vmul.f32 %v611_v10, %v603_v31  ;;  %v619_v36 = vmul.f32 %v615_v11, %v601_v30  ;;  %521 = vmatprep.subr.bf16.mxu1 %v502_v23  ;;  %v1242_v23 = vld [vmem:[%s1921_s5 + $0x6] sm:$0x3]  ;;  %v1255_v27 = vld [vmem:[%s1923_s7 + $0x10] sm:$0x3] }
 0x224   : > { %522 = vmatpush1.bf16.msra.mxu1 %v501_v24  ;;  %v981_v24 = vrot.slane %v1252_v21, %v1674_v54 }
 0x225   : > { %v467_v42 = vpack.c.bf16 %v464_v32, %v462_v18  ;;  %v599_v43 = vpop.permute.xlu1 %598  ;;  %v677_v44 = vpop.permute.xlu0 %676  ;;  %v468_v45 = vpack.c.bf16 %v465_v33, %v463_v19 }
 0x226   : > { %v602_v56 = vsel %vm600_vm4, %v1658_v47, %v599_v43  ;;  %v604_v46 = vsel %vm600_vm4, %v599_v43, %v1658_v47  ;;  %v681_v59 = vsel %vm680_vm5, %v1660_v48, %v677_v44  ;;  %v683_v60 = vsel %vm680_vm5, %v677_v44, %v1660_v48  ;;  %v466_v48 = vld [vmem:[%s1921_s5] sm:$0x3] }
 0x227   : > { %v620_v61 = vmul.f32 %v611_v10, %v604_v46  ;;  %v621_v63 = vmul.f32 %v615_v11, %v602_v56  ;;  %v698_v1 = vmul.f32 %v691_v25, %v683_v60  ;;  %v699_v2 = vmul.f32 %v695_v26, %v681_v59  ;;  %1236 = vmatmul.mubr.msk.bf16.vlgmr.msra.gmra.mxu1 %vm503_vm6, %v1235_v41 }
 0x228   : > { %565 = vmatprep.subr.bf16.mxu0 %v468_v45  ;;  %661 = vmatprep.mubr.bf16.mxu1 %v1420_v0  ;;  %v821_v11 = vrot.slane %v1246_v3, %v1674_v54  ;;  %v1061_v41 = vrot.slane %v1255_v27, %v1674_v54 }
 0x229   : > { %v624_v47 = vpack.c.bf16 %v620_v61, %v618_v34  ;;  %566 = vmatpush1.bf16.msra.mxu0 %v467_v42  ;;  %v679_v4 = vpop.permute.xlu1 %678  ;;  %v1749_v5 = vpop.permute.xlu0 %1042  ;;  %v625_v6 = vpack.c.bf16 %v621_v63, %v619_v36  ;;  %v1065_v42 = vrot.slane %v1255_v27, %v1677_v55  ;;  %v1247_v63 = vld [vmem:[%s1921_s5 + $0xa] sm:$0x3] }
 0x22a   : > { %v682_v7 = vsel %vm680_vm5, %v1662_v49, %v679_v4  ;;  %v684_v8 = vsel %vm680_vm5, %v679_v4, %v1662_v49  ;;  %v1239_v49 = vld [vmem:[%s1921_s5 + $0x4] sm:$0x3] }
 0x22b   : > { %v700_v9 = vmul.f32 %v691_v25, %v684_v8  ;;  %v701_v10 = vmul.f32 %v695_v26, %v682_v7  ;;  %643 = vmatprep.subr.bf16.mxu1 %v625_v6  ;;  %v985_v25 = vrot.slane %v1252_v21, %v1677_v55 }
 0x22c   : > { %1237 = vmatmul.mubr.msk.bf16.vlgmr.msra.gmra.mxu0 %vm503_vm6, %v466_v48  ;;  %644 = vmatpush1.bf16.msra.mxu1 %v624_v47 }
 0x22d   : > { %v704_v14 = vpack.c.bf16 %v700_v9, %v698_v1  ;;  %v1770_v15 = vpop.permute.xlu1 %1044  ;;  %773 = vmatprep.subr.bf16.mxu1 %v755_v40  ;;  %v807_v16 = vpop.permute.xlu0 %806  ;;  %v705_v17 = vpack.c.bf16 %v701_v10, %v699_v2  ;;  %741 = vmatprep.mubr.bf16.mxu0 %v1420_v0  ;;  %v905_v40 = vrot.slane %v1249_v13, %v1677_v55 }
 0x22e   : > { %v811_v18 = vsel %vm810_vm7, %v1664_v50, %v807_v16  ;;  %v813_v19 = vsel %vm810_vm7, %v807_v16, %v1664_v50 }
 0x22f   : > { %v828_v37 = vmul.f32 %v821_v11, %v811_v18  ;;  %v829_v38 = vmul.f32 %v825_v12, %v813_v19  ;;  %1240 = vmatmul.mubr.msk.bf16.vlgmr.msra.gmra.mxu1 %vm503_vm6, %v1239_v49  ;;  %723 = vmatprep.subr.bf16.mxu0 %v705_v17 }
 0x230   : > { %724 = vmatpush1.bf16.msra.mxu0 %v704_v14  ;;  %774 = vmatpush1.bf16.msra.mxu1 %v754_v39  ;;  %v1253_v14 = vld [vmem:[%s1921_s5 + $0xe] sm:$0x3] }
 0x231   : > { %v809_v50 = vpop.permute.xlu1 %808  ;;  %v887_v22 = vpop.permute.xlu0 %886  ;;  %791 = vmatprep.mubr.bf16.mxu1 %v1420_v0 }
 0x232   : > { %v812_v26 = vsel %vm810_vm7, %v1666_v51, %v809_v50  ;;  %v814_v29 = vsel %vm810_vm7, %v809_v50, %v1666_v51  ;;  %v891_v35 = vsel %vm890_vm8, %v1668_v52, %v887_v22  ;;  %v893_v39 = vsel %vm890_vm8, %v887_v22, %v1668_v52  ;;  %v1244_v51 = vld [vmem:[%s1921_s5 + $0x8] sm:$0x3] }
 0x233   : > { %v830_v28 = vmul.f32 %v821_v11, %v812_v26  ;;  %v831_v30 = vmul.f32 %v825_v12, %v814_v29  ;;  %v908_v31 = vmul.f32 %v901_v20, %v891_v35  ;;  %v909_v32 = vmul.f32 %v905_v40, %v893_v39 }
 0x234   : > { %1243 = vmatmul.mubr.msk.bf16.vlgmr.msra.gmra.mxu0 %vm503_vm6, %v1242_v23 }
 0x235   : > { %v834_v33 = vpack.c.bf16 %v830_v28, %v828_v37  ;;  %v889_v34 = vpop.permute.xlu1 %888  ;;  %v967_v36 = vpop.permute.xlu0 %966  ;;  %v835_v52 = vpack.c.bf16 %v831_v30, %v829_v38  ;;  %871 = vmatprep.mubr.bf16.mxu0 %v1420_v0 }
 0x236   : > { %v892_v43 = vsel %vm890_vm8, %v1682_v57, %v889_v34  ;;  %v894_v44 = vsel %vm890_vm8, %v889_v34, %v1682_v57  ;;  %v971_v45 = vsel %vm970_vm9, %v1684_v58, %v967_v36  ;;  %v973_v54 = vsel %vm970_vm9, %v967_v36, %v1684_v58 }
 0x237   : > { %v910_v56 = vmul.f32 %v901_v20, %v892_v43  ;;  %v911_v55 = vmul.f32 %v905_v40, %v894_v44  ;;  %v988_v46 = vmul.f32 %v981_v24, %v971_v45  ;;  %v989_v59 = vmul.f32 %v985_v25, %v973_v54  ;;  %1245 = vmatmul.mubr.msk.bf16.vlgmr.msra.gmra.mxu1 %vm503_vm6, %v1244_v51 }
 0x238   : > { %853 = vmatprep.subr.bf16.mxu0 %v835_v52  ;;  %951 = vmatprep.mubr.bf16.mxu1 %v1420_v0 }
 0x239   : > { %v914_v60 = vpack.c.bf16 %v910_v56, %v908_v31  ;;  %854 = vmatpush1.bf16.msra.mxu0 %v834_v33  ;;  %v969_v57 = vpop.permute.xlu1 %968  ;;  %v1047_v61 = vpop.permute.xlu0 %1046  ;;  %v915_v1 = vpack.c.bf16 %v911_v55, %v909_v32 }
 0x23a   : > { %v972_v58 = vsel %vm970_vm9, %v1692_v62, %v969_v57  ;;  %v974_v2 = vsel %vm970_vm9, %v969_v57, %v1692_v62  ;;  %v1051_v3 = vsel %vm1050_vm10, %v1749_v5, %v1047_v61  ;;  %v1053_v47 = vsel %vm1050_vm10, %v1047_v61, %v1749_v5  ;;  %v1250_v62 = vld [vmem:[%s1921_s5 + $0xc] sm:$0x3] }
 0x23b   : > { %v990_v4 = vmul.f32 %v981_v24, %v972_v58  ;;  %v991_v48 = vmul.f32 %v985_v25, %v974_v2  ;;  %v1068_v6 = vmul.f32 %v1061_v41, %v1051_v3  ;;  %v1069_v7 = vmul.f32 %v1065_v42, %v1053_v47  ;;  %933 = vmatprep.subr.bf16.mxu1 %v915_v1 }
 0x23c   : > { %1248 = vmatmul.mubr.msk.bf16.vlgmr.msra.gmra.mxu0 %vm503_vm6, %v1247_v63  ;;  %934 = vmatpush1.bf16.msra.mxu1 %v914_v60 }
 0x23d   : > { %v994_v8 = vpack.c.bf16 %v990_v4, %v988_v46  ;;  %v1049_v9 = vpop.permute.xlu1 %1048  ;;  %v995_v10 = vpack.c.bf16 %v991_v48, %v989_v59  ;;  %1031 = vmatprep.mubr.bf16.mxu0 %v1420_v0 }
 0x23e   : > { %v1052_v5 = vsel %vm1050_vm10, %v1770_v15, %v1049_v9  ;;  %v1054_v11 = vsel %vm1050_vm10, %v1049_v9, %v1770_v15 }
 0x23f   : > { %v1070_v12 = vmul.f32 %v1061_v41, %v1052_v5  ;;  %v1071_v13 = vmul.f32 %v1065_v42, %v1054_v11  ;;  %1251 = vmatmul.mubr.msk.bf16.vlgmr.msra.gmra.mxu1 %vm503_vm6, %v1250_v62  ;;  %1013 = vmatprep.subr.bf16.mxu0 %v995_v10 }
 0x240   : > { %1014 = vmatpush1.bf16.msra.mxu0 %v994_v8  ;;  %1111 = vmatprep.mubr.bf16.mxu1 %v1420_v0 }
 0x241   : > { %v1074_v49 = vpack.c.bf16 %v1070_v12, %v1068_v6  ;;  %v1075_v16 = vpack.c.bf16 %v1071_v13, %v1069_v7 }
 0x243   : > { %1093 = vmatprep.subr.bf16.mxu1 %v1075_v16 }
 0x244   : > { %1254 = vmatmul.mubr.msk.bf16.vlgmr.msra.gmra.mxu0 %vm503_vm6, %v1253_v14  ;;  %1094 = vmatpush1.bf16.msra.mxu1 %v1074_v49 }
 0x246   : > { %v1126_v47 = vpop.permute.xlu0 %1125 }
 0x247   : > { %1257 = vmatmul.mubr.msk.bf16.vlgmr.msra.gmra.mxu1 %vm503_vm6, %v1256_v53 }
 0x2e7   : > { %v541_v15 = vpop.f32.mrf.mxu1 }
 0x2e9   : > { %v543_v17 = vpop.f32.mrf.mxu1 }
 0x2eb   : > { %v545_v18 = vpop.f32.mrf.mxu1 }
 0x2ec   : > { %v585_v0 = vpop.f32.mrf.mxu0 }
 0x2ed   : > { %v546_v19 = vpop.f32.mrf.mxu1  ;;  %v586_v35 = vadd.f32 %v585_v0, %v541_v15 }
 0x2ee   : > { %v587_v20 = vpop.f32.mrf.mxu0 }
 0x2ef   : > { %v663_v21 = vpop.f32.mrf.mxu1  ;;  %v588_v28 = vadd.f32 %v587_v20, %v543_v17 }
 0x2f0   : > { %v589_v37 = vpop.f32.mrf.mxu0  ;;  %v670_v30 = vadd.f32 %v663_v21, %v586_v35 }
 0x2f1   : > { %v665_v38 = vpop.f32.mrf.mxu1 }
 0x2f2   : > { %v590_v40 = vpop.f32.mrf.mxu0  ;;  %v671_v51 = vadd.f32 %v665_v38, %v588_v28 }
 0x2f3   : > { %v667_v50 = vpop.f32.mrf.mxu1 }
 0x2f4   : > { %v743_v22 = vpop.f32.mrf.mxu0 }
 0x2f5   : > { %v668_v23 = vpop.f32.mrf.mxu1  ;;  %v750_v33 = vadd.f32 %v743_v22, %v670_v30 }
 0x2f6   : > { %v745_v24 = vpop.f32.mrf.mxu0 }
 0x2f7   : > { %v793_v25 = vpop.f32.mrf.mxu1  ;;  %v751_v52 = vadd.f32 %v745_v24, %v671_v51 }
 0x2f8   : > { %v747_v26 = vpop.f32.mrf.mxu0  ;;  %v800_v41 = vadd.f32 %v793_v25, %v750_v33 }
 0x2f9   : > { %v795_v29 = vpop.f32.mrf.mxu1 }
 0x2fa   : > { %v748_v39 = vpop.f32.mrf.mxu0  ;;  %v801_v44 = vadd.f32 %v795_v29, %v751_v52 }
 0x2fb   : > { %v797_v27 = vpop.f32.mrf.mxu1 }
 0x2fc   : > { %v873_v31 = vpop.f32.mrf.mxu0 }
 0x2fd   : > { %v798_v32 = vpop.f32.mrf.mxu1  ;;  %v880_v45 = vadd.f32 %v873_v31, %v800_v41 }
 0x2fe   : > { %v875_v34 = vpop.f32.mrf.mxu0 }
 0x2ff   : > { %v953_v36 = vpop.f32.mrf.mxu1  ;;  %v881_v55 = vadd.f32 %v875_v34, %v801_v44 }
 0x300   : > { %v877_v42 = vpop.f32.mrf.mxu0  ;;  %v960_v46 = vadd.f32 %v953_v36, %v880_v45 }
 0x301   : > { %v955_v43 = vpop.f32.mrf.mxu1 }
 0x302   : > { %v878_v54 = vpop.f32.mrf.mxu0  ;;  %v961_v57 = vadd.f32 %v955_v43, %v881_v55 }
 0x303   : > { %v957_v56 = vpop.f32.mrf.mxu1 }
 0x304   : > { %v1033_v59 = vpop.f32.mrf.mxu0 }
 0x305   : > { %v958_v60 = vpop.f32.mrf.mxu1  ;;  %v1040_v61 = vadd.f32 %v1033_v59, %v960_v46 }
 0x306   : > { %v1035_v63 = vpop.f32.mrf.mxu0 }
 0x307   : > { %v1113_v1 = vpop.f32.mrf.mxu1  ;;  %v1041_v58 = vadd.f32 %v1035_v63, %v961_v57 }
 0x308   : > { %v1120_v2 = vadd.f32 %v1113_v1, %v1040_v61  ;;  %v1037_v3 = vpop.f32.mrf.mxu0 }
 0x309   : > { %v1115_v4 = vpop.f32.mrf.mxu1 }
 0x30a   : > { %v1128_v48 = vadd.f32 %v1126_v47, %v1120_v2  ;;  %v1121_v6 = vadd.f32 %v1115_v4, %v1041_v58  ;;  %v1038_v7 = vpop.f32.mrf.mxu0 }
 0x30b   : > { %v1117_v62 = vpop.f32.mrf.mxu1 }
 0x30c   : > { %1130 = vst [vmem:[%s1590_s16] sm:$0xf] %v1128_v48  ;;  %v1129_v8 = vadd.f32 %v1126_v47, %v1121_v6 }
 0x30d   : > { %v1118_v9 = vpop.f32.mrf.mxu1 }
 0x30e   : > { %1131 = vst [vmem:[%s1590_s16 + $0x8] sm:$0xf] %v1129_v8 }
 0x30f   : > { %1366 = shalt.err (!%p1363_p10)
}
 0x310   : > { %s1367_s16 = scalar_lea.hbm %s1878_s15, 256  ;;  %s1371_s23 = scalar_lea.hbm %s1924_s8, 512 }
 0x311   : > { %p1368_p2 = scmp.ne.s32.totalorder %s1878_s15, %s1367_s16  ;;  %p1372_p7 = scmp.lt.s32.totalorder %s1878_s15, %s1924_s8 }
 0x312   : > { %p1373_p0 = scmp.lt.s32.totalorder %s1371_s23, %s1367_s16 }
 0x313   : > { %p1369_p4 = pnand %p1368_p2, %p1936_p12 }
 0x314   : > { %p1374_p6 = por %p1373_p0, %p1372_p7 }
 0x315   : > { %p1370_p9 = pneg %p1369_p4 }
 0x317   : > { %p1375_p11 = pnand %p1374_p6, %p1370_p9 }
 0x319   : > { %1378 = shalt.err (!%p1375_p11)
}
 0x31a   : > { %1267 = dma.vmem_to_hbm [thread:$0]  (%p1936_p12), %s1153_s20, 256, %s1878_s15, %s1138_s24  }
 0x31b PF: > { %s1164_s14 = sand.u32 1, %s1405_s27   ;;  %p1937_p13 = scmp.ne.s32.totalorder %s1931_s18, 0 }
 0x31c   : > { %p1938_p1 = scmp.ge.s32.totalorder %s1417_s30, 2  ;;  %s1165_s21 = scalar_lea.sflag [#allocation4], %s1164_s14 }
 0x31e   : > { %p1274_p3 = pnand %p1938_p1, %p1937_p13 }
 0x320   : > { %p1275_p5 = pneg %p1274_p3 }
 0x322   : > { %1400 = dma.done.wait (%p1275_p5), %s1165_s21, 256  }
 0x323   : > { %1402 = vsyncadd (%p1275_p5), %s1165_s21, 4294967040  ;;  %s1939_s26 = sld [smem:[#allocation8_spill]]  ;;  %p21_p8 = scmp.ge.s32.totalorder %s1501_s11, 4  }
 0x324   : > { %s1940_s27 = smov %s1409_s28  ;;  %s1941_s28 = smov %s1413_s29 }
 0x325   : > { %s1943_s30 = smov %s1501_s11  ;;  %23 = sbr.rel (!%p21_p8) target bundleno = 5 (0x5), region = 112 }
 0x329   : > { %s1942_s29 = smov %s1939_s26 }
 0x32a   :  { %1170 = vsyncpa [#allocation3], 1 }
 0x32b   :  { %1172 = vsyncpa [#allocation3 + $0x1], 1 }
 0x32c   :  { %1173 = vsyncpa [#allocation4], 1 }
 0x32d   :  { %1175 = vsyncpa [#allocation4 + $0x1], 1 }

</bundles_post_ra>
